<compile_context>
chip_gen: v5e
topology: v5e:2x2
jax: 0.10.0
libtpu: 0.0.40
codegen_flags: <defaults>
</compile_context>

<pallas_src>
import functools

import jax
import jax.numpy as jnp
from jax.experimental import pallas as pl
from jax.experimental.pallas import tpu as pltpu

_IN = 32          # input features
_HID = 128        # hidden width
_ACT = 6          # true number of actions
_ACT_PAD = 128    # lane-dense padded action dimension
_NEG = -1e30      # pad logit bias (added in f32) -> exp() underflows to exactly 0
_TILE = 16        # batch-tile alignment (bf16 sublane packing)


def _policy_kernel(x_ref, w1_ref, b1_ref, w2_ref, b2_ref, w3_ref, b3_ref, o_ref):
    # --- affine1 + (dropout=identity) + relu ---  (bf16 MXU inputs, f32 accum)
    h1 = jnp.dot(x_ref[...], w1_ref[...], preferred_element_type=jnp.float32)
    h1 = jnp.maximum(h1 + b1_ref[...], 0.0).astype(jnp.bfloat16)   # (TB,128)

    # --- affine2 + (dropout=identity) + relu ---
    h2 = jnp.dot(h1, w2_ref[...], preferred_element_type=jnp.float32)
    h2 = jnp.maximum(h2 + b2_ref[...], 0.0).astype(jnp.bfloat16)

    # --- affine3 (padded to 128 lane-dense columns) -> logits (f32) ---
    logits = jnp.dot(h2, w3_ref[...], preferred_element_type=jnp.float32)
    logits = logits + b3_ref[...]                  # pad columns get ~-1e30

    # --- softmax over the action axis; pad columns contribute exp()==0 ---
    m = jnp.max(logits, axis=-1, keepdims=True)
    e = jnp.exp(logits - m)
    denom = jnp.sum(e, axis=-1, keepdims=True)
    o_ref[...] = (e / denom).astype(o_ref.dtype)   # exact normalization


def _round_up(n, m):
    return ((n + m - 1) // m) * m


def _cdiv(a, b):
    return (a + b - 1) // b


def _choose_tiling(B, block_b):
    """Pick (TB, Bp): 16-aligned batch tile, >=2 grid steps when enough rows."""
    bp0 = _round_up(B, _TILE)
    min_steps = 2 if bp0 >= 2 * _TILE else 1        # let v7x shard across 2 TCs
    steps = max(min_steps, _cdiv(bp0, block_b))
    tb = _round_up(_cdiv(bp0, steps), _TILE)
    bp = _round_up(bp0, tb)
    return tb, bp


def prepare_params(w1, b1, w2, b2, w3, b3):
    """One-time parameter prep (hoisted out of the per-call path).

    Casts matmul weights to bf16 for the MXU and pads layer 3 from 6 to 128
    lane-dense output columns (zero weights, -1e30 bias).
    """
    w3p = jnp.zeros((_HID, _ACT_PAD), jnp.float32).at[:, :_ACT].set(
        w3.astype(jnp.float32))
    b3p = jnp.full((1, _ACT_PAD), _NEG, jnp.float32).at[:, :_ACT].set(
        b3.reshape(1, _ACT).astype(jnp.float32))
    return (w1.astype(jnp.bfloat16),
            b1.reshape(1, _HID).astype(jnp.float32),
            w2.astype(jnp.bfloat16),
            b2.reshape(1, _HID).astype(jnp.float32),
            w3p.astype(jnp.bfloat16),
            b3p)                                    # bias kept in f32


@functools.partial(jax.jit, static_argnames=("block_b", "return_padded"))
def _policy_forward_pallas(x, w1, b1, w2, b2, w3p, b3p, *,
                           block_b=4096, return_padded=False):
    """x: (B, 32) -> (B, 6) probs (or padded (Bp, 128) if return_padded)."""
    B = x.shape[0]
    TB, Bp = _choose_tiling(B, block_b)

    xp = x.astype(jnp.bfloat16)
    if Bp != B:
        xp = jnp.pad(xp, ((0, Bp - B), (0, 0)))

    grid = (Bp // TB,)

    flops = 2 * Bp * (_IN * _HID + _HID * _HID + _HID * _ACT_PAD)
    transcendentals = Bp * _ACT_PAD                          # exp
    bytes_accessed = (
        2 * Bp * _IN                                         # x (bf16)
        + 2 * (_IN * _HID + _HID * _HID + _HID * _ACT_PAD)   # weights (bf16)
        + 4 * (3 * _HID)                                     # biases (f32)
        + 4 * Bp * _ACT_PAD)                                 # out (f32)

    out = pl.pallas_call(
        _policy_kernel,
        out_shape=jax.ShapeDtypeStruct((Bp, _ACT_PAD), jnp.float32),
        grid=grid,
        in_specs=[
            pl.BlockSpec((TB, _IN), lambda i: (i, 0)),         # x tile (bf16)
            pl.BlockSpec((_IN, _HID), lambda i: (0, 0)),       # W1 (resident)
            pl.BlockSpec((1, _HID), lambda i: (0, 0)),         # b1
            pl.BlockSpec((_HID, _HID), lambda i: (0, 0)),      # W2
            pl.BlockSpec((1, _HID), lambda i: (0, 0)),         # b2
            pl.BlockSpec((_HID, _ACT_PAD), lambda i: (0, 0)),  # W3 (padded)
            pl.BlockSpec((1, _ACT_PAD), lambda i: (0, 0)),     # b3 (padded)
        ],
        out_specs=pl.BlockSpec((TB, _ACT_PAD), lambda i: (i, 0)),
        compiler_params=pltpu.CompilerParams(
            dimension_semantics=("parallel",)),
        cost_estimate=pl.CostEstimate(
            flops=flops,
            transcendentals=transcendentals,
            bytes_accessed=bytes_accessed),
    )(xp, w1, b1, w2, b2, w3p, b3p)

    if return_padded:
        return out            # (Bp, 128); columns 6..127 are exactly 0
    return out[:B, :_ACT]


@jax.jit
def _policy_forward_small(x, w1, b1, w2, b2, w3p, b3p):
    """Plain-JAX fast path for tiny batches (mirrors the kernel math)."""
    h1 = jnp.maximum(
        jnp.dot(x.astype(jnp.bfloat16), w1, preferred_element_type=jnp.float32)
        + b1, 0.0)
    h2 = jnp.maximum(
        jnp.dot(h1.astype(jnp.bfloat16), w2, preferred_element_type=jnp.float32)
        + b2, 0.0)
    logits = jnp.dot(h2.astype(jnp.bfloat16), w3p,
                     preferred_element_type=jnp.float32) + b3p
    return jax.nn.softmax(logits[:, :_ACT], axis=-1)


def policy_forward(x, params, *, block_b=4096, min_pallas_batch=128,
                   return_padded=False):
    """Dispatch: Pallas kernel for real batches, plain JAX for per-step tiny B."""
    if x.shape[0] < min_pallas_batch:
        return _policy_forward_small(x, *params)
    return _policy_forward_pallas(x, *params, block_b=block_b,
                                  return_padded=return_padded)


def policy_reference(x, w1, b1, w2, b2, w3, b3):
    """Pure-f32 JAX reference matching the PyTorch forward (eval-mode dropout)."""
    h1 = jnp.maximum(x @ w1 + b1, 0.0)
    h2 = jnp.maximum(h1 @ w2 + b2, 0.0)
    logits = h2 @ w3 + b3
    return jax.nn.softmax(logits, axis=-1)


def init_params(key):
    """Deterministic PyTorch-style (Kaiming-uniform-ish) init for the 3 Linears."""
    ks = jax.random.split(key, 6)

    def linear(kw, kb, fan_in, fan_out):
        bound = 1.0 / jnp.sqrt(fan_in)
        w = jax.random.uniform(kw, (fan_in, fan_out), jnp.float32, -bound, bound)
        b = jax.random.uniform(kb, (1, fan_out), jnp.float32, -bound, bound)
        return w, b

    w1, b1 = linear(ks[0], ks[1], _IN, _HID)
    w2, b2 = linear(ks[2], ks[3], _HID, _HID)
    w3, b3 = linear(ks[4], ks[5], _HID, _ACT)
    return w1, b1, w2, b2, w3, b3


if __name__ == "__main__":
    key = jax.random.PRNGKey(0)
    k_x1, k_x2, k_p = jax.random.split(key, 3)

    params_f32 = init_params(k_p)
    params = prepare_params(*params_f32)          # one-time bf16 cast + padding

    # Batch large enough to exercise the Pallas path (>=2 batch tiles).
    B = 256
    x = jax.random.normal(k_x1, (B, _IN), jnp.float32)
    probs = jax.block_until_ready(policy_forward(x, params))

    # sanity: rows are valid probability distributions over 6 actions
    assert probs.shape == (B, _ACT)
    assert bool(jnp.all(jnp.isfinite(probs)))
    assert bool(jnp.all(probs >= 0.0))
    assert bool(jnp.allclose(jnp.sum(probs, axis=1), 1.0, atol=1e-4))

    # tight check vs a JAX path with identical (bf16-input) arithmetic
    ref_bf16 = jax.block_until_ready(_policy_forward_small(x, *params))
    assert bool(jnp.allclose(probs, ref_bf16, atol=1e-3, rtol=1e-3))

    # loose check vs the full-f32 PyTorch-equivalent reference (bf16 MXU inputs)
    ref_f32 = policy_reference(x, *params_f32)
    assert bool(jnp.allclose(probs, ref_f32, atol=3e-2, rtol=3e-2))

    # tiny per-step batch (typical REINFORCE action selection) -> plain-JAX path
    x_small = jax.random.normal(k_x2, (8, _IN), jnp.float32)
    probs_small = jax.block_until_ready(policy_forward(x_small, params))
    assert probs_small.shape == (8, _ACT)
    assert bool(jnp.allclose(jnp.sum(probs_small, axis=1), 1.0, atol=1e-4))

    print("KERNEL_OK")
</pallas_src>

<mosaic_0001>
module attributes {stable_mosaic.version = 11 : i64} {
  func.func @_policy_kernel(%arg0: i32, %arg1: memref<128x32xbf16, #tpu.memory_space<vmem>>, %arg2: memref<32x128xbf16, #tpu.memory_space<vmem>>, %arg3: memref<1x128xf32, #tpu.memory_space<vmem>>, %arg4: memref<128x128xbf16, #tpu.memory_space<vmem>>, %arg5: memref<1x128xf32, #tpu.memory_space<vmem>>, %arg6: memref<128x128xbf16, #tpu.memory_space<vmem>>, %arg7: memref<1x128xf32, #tpu.memory_space<vmem>>, %arg8: memref<128x128xf32, #tpu.memory_space<vmem>>) attributes {dimension_semantics = [#tpu.dimension_semantics<parallel>], iteration_bounds = array<i64: 2>, scalar_prefetch = 0 : i64, scratch_operands = 0 : i64, tpu.core_type = #tpu.core_type<tc>, window_params = [{transform_indices = @transform_0, window_bounds = array<i64: 128, 32>}, {pipeline_mode = #tpu.pipeline_mode<synchronous>, transform_indices = @transform_1, window_bounds = array<i64: 32, 128>}, {pipeline_mode = #tpu.pipeline_mode<synchronous>, transform_indices = @transform_2, window_bounds = array<i64: 1, 128>}, {pipeline_mode = #tpu.pipeline_mode<synchronous>, transform_indices = @transform_3, window_bounds = array<i64: 128, 128>}, {pipeline_mode = #tpu.pipeline_mode<synchronous>, transform_indices = @transform_4, window_bounds = array<i64: 1, 128>}, {pipeline_mode = #tpu.pipeline_mode<synchronous>, transform_indices = @transform_5, window_bounds = array<i64: 128, 128>}, {pipeline_mode = #tpu.pipeline_mode<synchronous>, transform_indices = @transform_6, window_bounds = array<i64: 1, 128>}, {transform_indices = @transform_7, window_bounds = array<i64: 128, 128>}]} {
    %c0 = arith.constant 0 : index
    %c0_0 = arith.constant 0 : index
    %0 = vector.load %arg1[%c0, %c0_0] : memref<128x32xbf16, #tpu.memory_space<vmem>>, vector<128x32xbf16>
    %c0_1 = arith.constant 0 : index
    %c0_2 = arith.constant 0 : index
    %1 = vector.load %arg2[%c0_1, %c0_2] : memref<32x128xbf16, #tpu.memory_space<vmem>>, vector<32x128xbf16>
    %cst = arith.constant dense<0.000000e+00> : vector<128x128xf32>
    %2 = tpu.matmul %0, %1, %cst {dimension_numbers = #tpu.dot_dimension_numbers<[1], [0], [0], [1], [0, 0, 1, 1], [], []>} : vector<128x32xbf16>, vector<32x128xbf16>, vector<128x128xf32> -> vector<128x128xf32>
    %c0_3 = arith.constant 0 : index
    %c0_4 = arith.constant 0 : index
    %3 = vector.load %arg3[%c0_3, %c0_4] : memref<1x128xf32, #tpu.memory_space<vmem>>, vector<1x128xf32>
    %4 = vector.broadcast %3 : vector<1x128xf32> to vector<128x128xf32>
    %5 = arith.addf %2, %4 : vector<128x128xf32>
    %cst_5 = arith.constant 0.000000e+00 : f32
    %6 = vector.broadcast %cst_5 : f32 to vector<128x128xf32>
    %7 = arith.maximumf %5, %6 : vector<128x128xf32>
    %8 = arith.truncf %7 : vector<128x128xf32> to vector<128x128xbf16>
    %c0_6 = arith.constant 0 : index
    %c0_7 = arith.constant 0 : index
    %9 = vector.load %arg4[%c0_6, %c0_7] : memref<128x128xbf16, #tpu.memory_space<vmem>>, vector<128x128xbf16>
    %cst_8 = arith.constant dense<0.000000e+00> : vector<128x128xf32>
    %10 = tpu.matmul %8, %9, %cst_8 {dimension_numbers = #tpu.dot_dimension_numbers<[1], [0], [0], [1], [0, 0, 1, 1], [], []>} : vector<128x128xbf16>, vector<128x128xbf16>, vector<128x128xf32> -> vector<128x128xf32>
    %c0_9 = arith.constant 0 : index
    %c0_10 = arith.constant 0 : index
    %11 = vector.load %arg5[%c0_9, %c0_10] : memref<1x128xf32, #tpu.memory_space<vmem>>, vector<1x128xf32>
    %12 = vector.broadcast %11 : vector<1x128xf32> to vector<128x128xf32>
    %13 = arith.addf %10, %12 : vector<128x128xf32>
    %cst_11 = arith.constant 0.000000e+00 : f32
    %14 = vector.broadcast %cst_11 : f32 to vector<128x128xf32>
    %15 = arith.maximumf %13, %14 : vector<128x128xf32>
    %16 = arith.truncf %15 : vector<128x128xf32> to vector<128x128xbf16>
    %c0_12 = arith.constant 0 : index
    %c0_13 = arith.constant 0 : index
    %17 = vector.load %arg6[%c0_12, %c0_13] : memref<128x128xbf16, #tpu.memory_space<vmem>>, vector<128x128xbf16>
    %cst_14 = arith.constant dense<0.000000e+00> : vector<128x128xf32>
    %18 = tpu.matmul %16, %17, %cst_14 {dimension_numbers = #tpu.dot_dimension_numbers<[1], [0], [0], [1], [0, 0, 1, 1], [], []>} : vector<128x128xbf16>, vector<128x128xbf16>, vector<128x128xf32> -> vector<128x128xf32>
    %c0_15 = arith.constant 0 : index
    %c0_16 = arith.constant 0 : index
    %19 = vector.load %arg7[%c0_15, %c0_16] : memref<1x128xf32, #tpu.memory_space<vmem>>, vector<1x128xf32>
    %20 = vector.broadcast %19 : vector<1x128xf32> to vector<128x128xf32>
    %21 = arith.addf %18, %20 : vector<128x128xf32>
    %cst_17 = arith.constant dense<0xFF800000> : vector<128xf32>
    %22 = vector.multi_reduction <maximumf>, %21, %cst_17 [1] : vector<128x128xf32> to vector<128xf32>
    %23 = vector.shape_cast %22 : vector<128xf32> to vector<128x1xf32>
    %24 = vector.broadcast %23 : vector<128x1xf32> to vector<128x128xf32>
    %25 = arith.subf %21, %24 : vector<128x128xf32>
    %26 = math.exp %25 : vector<128x128xf32>
    %cst_18 = arith.constant dense<0.000000e+00> : vector<128xf32>
    %27 = vector.multi_reduction <add>, %26, %cst_18 [1] : vector<128x128xf32> to vector<128xf32>
    %28 = vector.shape_cast %27 : vector<128xf32> to vector<128x1xf32>
    %29 = vector.broadcast %28 : vector<128x1xf32> to vector<128x128xf32>
    %30 = arith.divf %26, %29 : vector<128x128xf32>
    %c0_19 = arith.constant 0 : index
    %c0_20 = arith.constant 0 : index
    %31 = vector.load %arg8[%c0_19, %c0_20] : memref<128x128xf32, #tpu.memory_space<vmem>>, vector<128x128xf32>
    tpu.vector_store %arg8[%c0_19, %c0_20], %30 {strides = array<i32>} : memref<128x128xf32, #tpu.memory_space<vmem>>, vector<128x128xf32>,
    return
  }
  func.func @transform_0(%arg0: i32) -> (i32, i32) {
    %c0_i32 = arith.constant 0 : i32
    %c0_i32_0 = arith.constant 0 : i32
    return %arg0, %c0_i32 : i32, i32
  }
  func.func @transform_1(%arg0: i32) -> (i32, i32) {
    %c0_i32 = arith.constant 0 : i32
    %c0_i32_0 = arith.constant 0 : i32
    %c0_i32_1 = arith.constant 0 : i32
    return %c0_i32, %c0_i32_0 : i32, i32
  }
  func.func @transform_2(%arg0: i32) -> (i32, i32) {
    %c0_i32 = arith.constant 0 : i32
    %c0_i32_0 = arith.constant 0 : i32
    %c0_i32_1 = arith.constant 0 : i32
    return %c0_i32, %c0_i32_0 : i32, i32
  }
  func.func @transform_3(%arg0: i32) -> (i32, i32) {
    %c0_i32 = arith.constant 0 : i32
    %c0_i32_0 = arith.constant 0 : i32
    %c0_i32_1 = arith.constant 0 : i32
    return %c0_i32, %c0_i32_0 : i32, i32
  }
  func.func @transform_4(%arg0: i32) -> (i32, i32) {
    %c0_i32 = arith.constant 0 : i32
    %c0_i32_0 = arith.constant 0 : i32
    %c0_i32_1 = arith.constant 0 : i32
    return %c0_i32, %c0_i32_0 : i32, i32
  }
  func.func @transform_5(%arg0: i32) -> (i32, i32) {
    %c0_i32 = arith.constant 0 : i32
    %c0_i32_0 = arith.constant 0 : i32
    %c0_i32_1 = arith.constant 0 : i32
    return %c0_i32, %c0_i32_0 : i32, i32
  }
  func.func @transform_6(%arg0: i32) -> (i32, i32) {
    %c0_i32 = arith.constant 0 : i32
    %c0_i32_0 = arith.constant 0 : i32
    %c0_i32_1 = arith.constant 0 : i32
    return %c0_i32, %c0_i32_0 : i32, i32
  }
  func.func @transform_7(%arg0: i32) -> (i32, i32) {
    %c0_i32 = arith.constant 0 : i32
    %c0_i32_0 = arith.constant 0 : i32
    return %arg0, %c0_i32 : i32, i32
  }
}

</mosaic_0001>

<bundles_post_ra>
// kernel: _policy_forward_pallas.1
= control target key start
LH: loop header
LB: loop body
LE: loop exit
PB: predicated region body
PF: predicated region fallthrough
CT: control target
= control target key end

     0   :  { %s1427_s24 = smov 0   ;;  %s1673_s0 = inlined_call_operand.vmem [shape: bf16[256,32], index: 0, kind: input, shape index: {}]   ;;  %s1674_s1 = inlined_call_operand.vmem [shape: bf16[32,128], index: 1, kind: input, shape index: {}]   ;;  %s1675_s2 = inlined_call_operand.vmem [shape: f32[1,128], index: 2, kind: input, shape index: {}]   ;;  %s1676_s3 = inlined_call_operand.vmem [shape: bf16[128,128], index: 3, kind: input, shape index: {}]   ;;  %s1677_s4 = inlined_call_operand.vmem [shape: f32[1,128], index: 4, kind: input, shape index: {}]   ;;  %s1678_s5 = inlined_call_operand.vmem [shape: bf16[128,128], index: 5, kind: input, shape index: {}]   ;;  %s1679_s6 = inlined_call_operand.vmem [shape: f32[1,128], index: 6, kind: input, shape index: {}]   ;;  %s1680_s7 = inlined_call_operand.vmem [shape: f32[256,128], index: 7, kind: output, shape index: {}]  }
   0x1 LB: > { %s1139_s25 = sadd.s32 4294967295, %s1385_s24   ;;  %p1143_p0 = scmp.ge.s32.totalorder %s1385_s24, 1  ;;  %s1385_s24 = sphi %s1427_s24, %s17_s24  }
   0x2   : > { %p238_p1 = scmp.lt.s32.totalorder %s1385_s24, 3 }
   0x4   : > { %p239_p2 = pnand %p1143_p0, %p238_p1 }
   0x5   : > { %s1144_s28 = sshll.u32 (!%p239_p2), %s1139_s25, 4 }
   0x6   : > { %242 = sbr.rel (%p239_p2) target bundleno = 822 (0x336), region = 48  ;;  %p271_p3 = scmp.lt.s32.totalorder (!%p239_p2), %s1144_s28, 31 }
   0xb   : > { %v1271_v0 = vld [vmem:[%s1674_s1 + $0x8] sm:$0xff]  ;;  %v1270_v1 = vld [vmem:[%s1674_s1] sm:$0xff]  ;;  %s1682_s28 = smov (!%p271_p3, %s1144_s28), 31  ;;  %vm359_vm0 = vcmask 261120   ;;  %v1279_v7 = vld [vmem:[%s1676_s3 + $0x38] sm:$0xff] }
   0xc   : > { %390 = vmatpush.bf16.msra.mxu0 %v1271_v0  ;;  %s1145_s8 = sshll.u32 %s1682_s28, 2  ;;  %525 = vmatpush.bf16.msra.mxu1 %v1279_v7  ;;  %v1278_v9 = vld [vmem:[%s1676_s3 + $0x30] sm:$0xff]  ;;  %v1277_v10 = vld [vmem:[%s1676_s3 + $0x28] sm:$0xff]  ;;  %v1276_v11 = vld [vmem:[%s1676_s3 + $0x20] sm:$0xff] }
   0xd   : > { %s1447_s11 = scalar_lea.vmem %s1673_s0, %s1145_s8  ;;  %1288 = vmatpush.bf16.msra.mxu3 %v1279_v7  ;;  %v1275_v12 = vld [vmem:[%s1676_s3 + $0x18] sm:$0xff]  ;;  %v1274_v14 = vld [vmem:[%s1676_s3 + $0x10] sm:$0xff]  ;;  %v1273_v15 = vld [vmem:[%s1676_s3 + $0x8] sm:$0xff]  ;;  %s1147_s8 = sshll.u32 %s1682_s28, 3 }
   0xe   : > { %v1262_v2 = vld [vmem:[%s1447_s11] sm:$0xff]  ;;  %v1263_v3 = vld [vmem:[%s1447_s11 + $0x8] sm:$0xff]  ;;  %v1264_v4 = vld [vmem:[%s1447_s11 + $0x10] sm:$0xff] }
   0xf   : > { %v1265_v5 = vld [vmem:[%s1447_s11 + $0x18] sm:$0xff]  ;;  %v1266_v6 = vld [vmem:[%s1447_s11 + $0x20] sm:$0xff]  ;;  %v1267_v8 = vld [vmem:[%s1447_s11 + $0x28] sm:$0xff] }
  0x10   : > { %391 = vmatpush.bf16.msra.mxu0 %v1270_v1  ;;  %526 = vmatpush.bf16.msra.mxu1 %v1278_v9  ;;  %v1268_v13 = vld [vmem:[%s1447_s11 + $0x30] sm:$0xff]  ;;  %v1272_v16 = vld [vmem:[%s1676_s3] sm:$0xff]  ;;  %v1269_v17 = vld [vmem:[%s1447_s11 + $0x38] sm:$0xff]  ;;  %s1636_s11 = scalar_lea.vmem %s1680_s7, %s1147_s8 }
  0x11   : > { %1289 = vmatpush.bf16.msra.mxu3 %v1278_v9  ;;  %v1492_v19 = vld [vmem:[%s1675_s2] ss:$0 sm:$0xff]  ;;  %v1287_v58 = vld [vmem:[%s1678_s5 + $0x38] sm:$0xff]  ;;  %v1286_v62 = vld [vmem:[%s1678_s5 + $0x30] sm:$0xff] }
  0x12   : > { %666 = vmatpush.bf16.msra.mxu2 %v1287_v58  ;;  %v1285_v0 = vld [vmem:[%s1678_s5 + $0x28] sm:$0xff]  ;;  %v1284_v1 = vld [vmem:[%s1678_s5 + $0x20] sm:$0xff]  ;;  %v1282_v9 = vld [vmem:[%s1678_s5 + $0x10] sm:$0xff] }
  0x13   : > { %1188 = vmatmul.msk.bf16.vlgmr.msra.gmra.mxu0 %vm359_vm0, %v1262_v2 }
  0x14   : > { %527 = vmatpush.bf16.msra.mxu1 %v1277_v10 }
  0x15   : > { %1290 = vmatpush.bf16.msra.mxu3 %v1277_v10 }
  0x16   : > { %667 = vmatpush.bf16.msra.mxu2 %v1286_v62 }
  0x18   : > { %528 = vmatpush.bf16.msra.mxu1 %v1276_v11 }
  0x19   : > { %1291 = vmatpush.bf16.msra.mxu3 %v1276_v11  ;;  %v1281_v11 = vld [vmem:[%s1678_s5 + $0x8] sm:$0xff] }
  0x1a   : > { %668 = vmatpush.bf16.msra.mxu2 %v1285_v0 }
  0x1c   : > { %529 = vmatpush.bf16.msra.mxu1 %v1275_v12 }
  0x1d   : > { %1292 = vmatpush.bf16.msra.mxu3 %v1275_v12  ;;  %v1280_v12 = vld [vmem:[%s1678_s5] sm:$0xff] }
  0x1e   : > { %669 = vmatpush.bf16.msra.mxu2 %v1284_v1 }
  0x20   : > { %530 = vmatpush.bf16.msra.mxu1 %v1274_v14 }
  0x21   : > { %1293 = vmatpush.bf16.msra.mxu3 %v1274_v14 }
  0x23   : > { %1189 = vmatmul.msk.bf16.gmra.mxu0 %vm359_vm0, %v1263_v3 }
  0x24   : > { %531 = vmatpush.bf16.msra.mxu1 %v1273_v15 }
  0x25   : > { %1294 = vmatpush.bf16.msra.mxu3 %v1273_v15 }
  0x28   : > { %532 = vmatpush.bf16.msra.mxu1 %v1272_v16 }
  0x29   : > { %1295 = vmatpush.bf16.msra.mxu3 %v1272_v16 }
  0x2d   : > { %1296 = vmatpush.bf16.msrb.mxu3 %v1287_v58 }
  0x31   : > { %1297 = vmatpush.bf16.msrb.mxu3 %v1286_v62 }
  0x33   : > { %1190 = vmatmul.msk.bf16.gmra.mxu0 %vm359_vm0, %v1264_v4 }
  0x35   : > { %1298 = vmatpush.bf16.msrb.mxu3 %v1285_v0 }
  0x39   : > { %1299 = vmatpush.bf16.msrb.mxu3 %v1284_v1 }
  0x43   : > { %1191 = vmatmul.msk.bf16.gmra.mxu0 %vm359_vm0, %v1265_v5  ;;  %v1283_v5 = vld [vmem:[%s1678_s5 + $0x18] sm:$0xff] }
  0x44   : > { %670 = vmatpush.bf16.msra.mxu2 %v1283_v5  ;;  %1300 = vmatpush.bf16.msrb.mxu3 %v1283_v5 }
  0x48   : > { %671 = vmatpush.bf16.msra.mxu2 %v1282_v9  ;;  %1301 = vmatpush.bf16.msrb.mxu3 %v1282_v9 }
  0x4c   : > { %672 = vmatpush.bf16.msra.mxu2 %v1281_v11  ;;  %1302 = vmatpush.bf16.msrb.mxu3 %v1281_v11 }
  0x50   : > { %673 = vmatpush.bf16.msra.mxu2 %v1280_v12  ;;  %1303 = vmatpush.bf16.msrb.mxu3 %v1280_v12  ;;  %v1314_v12 = vld [vmem:[%s1679_s6] ss:$0 sm:$0xff] }
  0x53   : > { %1192 = vmatmul.msk.bf16.gmra.mxu0 %vm359_vm0, %v1266_v6 }
  0x63   : > { %1193 = vmatmul.msk.bf16.gmra.mxu0 %vm359_vm0, %v1267_v8 }
  0x73   : > { %1194 = vmatmul.msk.bf16.gmra.mxu0 %vm359_vm0, %v1268_v13 }
  0x83   : > { %1195 = vmatmul.msk.bf16.gmra.mxu0 %vm359_vm0, %v1269_v17 }
  0x90   : > { %v393_v18 = vpop.f32.mrf.mxu0 }
  0x91   : > { %v394_v20 = vadd.f32 %v1492_v19, %v393_v18 }
  0x93   : > { %v433_v23 = vmax.f32 %v394_v20, 0.0 }
  0x98   : > { %v395_v21 = vpop.f32.mrf.mxu0 }
  0x99   : > { %v396_v22 = vadd.f32 %v1492_v19, %v395_v21  ;;  %v1313_v21 = vld [vmem:[%s1677_s4] ss:$0 sm:$0xff] }
  0x9b   : > { %v434_v24 = vmax.f32 %v396_v22, 0.0 }
  0x9d   : > { %v449_v25 = vpack.c.bf16 %v434_v24, %v433_v23 }
  0x9f   : > { %533 = vmatmul.bf16.vlgmr.msra.gmra.mxu1 %v449_v25 }
  0xa0   : > { %v398_v26 = vpop.f32.mrf.mxu0 }
  0xa1   : > { %v399_v27 = vadd.f32 %v1492_v19, %v398_v26 }
  0xa3   : > { %v435_v30 = vmax.f32 %v399_v27, 0.0 }
  0xa8   : > { %v400_v28 = vpop.f32.mrf.mxu0 }
  0xa9   : > { %v401_v29 = vadd.f32 %v1492_v19, %v400_v28 }
  0xab   : > { %v436_v31 = vmax.f32 %v401_v29, 0.0 }
  0xad   : > { %v450_v32 = vpack.c.bf16 %v436_v31, %v435_v30 }
  0xaf   : > { %538 = vmatmul.bf16.gmra.mxu1 %v450_v32 }
  0xb0   : > { %v403_v33 = vpop.f32.mrf.mxu0 }
  0xb1   : > { %v404_v34 = vadd.f32 %v1492_v19, %v403_v33 }
  0xb3   : > { %v437_v37 = vmax.f32 %v404_v34, 0.0 }
  0xb8   : > { %v405_v35 = vpop.f32.mrf.mxu0 }
  0xb9   : > { %v406_v36 = vadd.f32 %v1492_v19, %v405_v35 }
  0xbb   : > { %v438_v38 = vmax.f32 %v406_v36, 0.0 }
  0xbd   : > { %v451_v39 = vpack.c.bf16 %v438_v38, %v437_v37 }
  0xbf   : > { %543 = vmatmul.bf16.gmra.mxu1 %v451_v39 }
  0xc0   : > { %v408_v40 = vpop.f32.mrf.mxu0 }
  0xc1   : > { %v409_v41 = vadd.f32 %v1492_v19, %v408_v40 }
  0xc3   : > { %v439_v44 = vmax.f32 %v409_v41, 0.0 }
  0xc8   : > { %v410_v42 = vpop.f32.mrf.mxu0 }
  0xc9   : > { %v411_v43 = vadd.f32 %v1492_v19, %v410_v42 }
  0xcb   : > { %v440_v45 = vmax.f32 %v411_v43, 0.0 }
  0xcd   : > { %v452_v46 = vpack.c.bf16 %v440_v45, %v439_v44 }
  0xcf   : > { %548 = vmatmul.bf16.gmra.mxu1 %v452_v46 }
  0xd0   : > { %v413_v47 = vpop.f32.mrf.mxu0 }
  0xd1   : > { %v414_v48 = vadd.f32 %v1492_v19, %v413_v47 }
  0xd3   : > { %v441_v51 = vmax.f32 %v414_v48, 0.0 }
  0xd8   : > { %v415_v49 = vpop.f32.mrf.mxu0 }
  0xd9   : > { %v416_v50 = vadd.f32 %v1492_v19, %v415_v49 }
  0xdb   : > { %v442_v52 = vmax.f32 %v416_v50, 0.0 }
  0xdd   : > { %v453_v53 = vpack.c.bf16 %v442_v52, %v441_v51 }
  0xdf   : > { %553 = vmatmul.bf16.gmra.mxu1 %v453_v53 }
  0xe0   : > { %v418_v54 = vpop.f32.mrf.mxu0 }
  0xe1   : > { %v419_v55 = vadd.f32 %v1492_v19, %v418_v54 }
  0xe3   : > { %v443_v59 = vmax.f32 %v419_v55, 0.0 }
  0xe8   : > { %v420_v56 = vpop.f32.mrf.mxu0 }
  0xe9   : > { %v421_v57 = vadd.f32 %v1492_v19, %v420_v56 }
  0xeb   : > { %v444_v60 = vmax.f32 %v421_v57, 0.0 }
  0xed   : > { %v454_v61 = vpack.c.bf16 %v444_v60, %v443_v59 }
  0xef   : > { %558 = vmatmul.bf16.gmra.mxu1 %v454_v61 }
  0xf0   : > { %v423_v63 = vpop.f32.mrf.mxu0 }
  0xf1   : > { %v424_v2 = vadd.f32 %v1492_v19, %v423_v63 }
  0xf3   : > { %v445_v6 = vmax.f32 %v424_v2, 0.0 }
  0xf8   : > { %v425_v3 = vpop.f32.mrf.mxu0 }
  0xf9   : > { %v426_v4 = vadd.f32 %v1492_v19, %v425_v3 }
  0xfb   : > { %v446_v7 = vmax.f32 %v426_v4, 0.0 }
  0xfd   : > { %v455_v8 = vpack.c.bf16 %v446_v7, %v445_v6 }
  0xff   : > { %563 = vmatmul.bf16.vlgmr.msra.gmra.mxu3 %v455_v8 }
 0x100   : > { %v428_v10 = vpop.f32.mrf.mxu0 }
 0x101   : > { %v429_v13 = vadd.f32 %v1492_v19, %v428_v10 }
 0x103   : > { %v447_v16 = vmax.f32 %v429_v13, 0.0 }
 0x108   : > { %v430_v14 = vpop.f32.mrf.mxu0 }
 0x109   : > { %v431_v15 = vadd.f32 %v1492_v19, %v430_v14 }
 0x10b   : > { %v448_v17 = vmax.f32 %v431_v15, 0.0 }
 0x10d   : > { %v456_v18 = vpack.c.bf16 %v448_v17, %v447_v16 }
 0x10f   : > { %568 = vmatmul.bf16.gmra.mxu3 %v456_v18 }
 0x11c   : > { %v534_v20 = vpop.f32.mrf.mxu1 }
 0x11d   : > { %v535_v22 = vadd.f32 %v1313_v21, %v534_v20 }
 0x11f   : > { %v574_v25 = vmax.f32 %v535_v22, 0.0 }
 0x124   : > { %v536_v23 = vpop.f32.mrf.mxu1 }
 0x125   : > { %v537_v24 = vadd.f32 %v1313_v21, %v536_v23 }
 0x127   : > { %v575_v26 = vmax.f32 %v537_v24, 0.0 }
 0x129   : > { %v590_v27 = vpack.c.bf16 %v575_v26, %v574_v25 }
 0x12b   : > { %674 = vmatmul.bf16.vlgmr.msra.gmra.mxu2 %v590_v27 }
 0x12c   : > { %v539_v28 = vpop.f32.mrf.mxu1 }
 0x12d   : > { %v540_v29 = vadd.f32 %v1313_v21, %v539_v28 }
 0x12f   : > { %v576_v31 = vmax.f32 %v540_v29, 0.0 }
 0x134   : > { %v541_v30 = vpop.f32.mrf.mxu1 }
 0x135   : > { %v542_v19 = vadd.f32 %v1313_v21, %v541_v30 }
 0x137   : > { %v577_v32 = vmax.f32 %v542_v19, 0.0 }
 0x139   : > { %v591_v33 = vpack.c.bf16 %v577_v32, %v576_v31 }
 0x13b   : > { %679 = vmatmul.bf16.gmra.mxu2 %v591_v33 }
 0x13c   : > { %v544_v34 = vpop.f32.mrf.mxu1 }
 0x13d   : > { %v545_v35 = vadd.f32 %v1313_v21, %v544_v34 }
 0x13f   : > { %v578_v38 = vmax.f32 %v545_v35, 0.0 }
 0x144   : > { %v546_v36 = vpop.f32.mrf.mxu1 }
 0x145   : > { %v547_v37 = vadd.f32 %v1313_v21, %v546_v36 }
 0x147   : > { %v579_v39 = vmax.f32 %v547_v37, 0.0 }
 0x149   : > { %v592_v40 = vpack.c.bf16 %v579_v39, %v578_v38 }
 0x14b   : > { %684 = vmatmul.bf16.gmra.mxu2 %v592_v40 }
 0x14c   : > { %v549_v41 = vpop.f32.mrf.mxu1 }
 0x14d   : > { %v550_v42 = vadd.f32 %v1313_v21, %v549_v41 }
 0x14f   : > { %v580_v45 = vmax.f32 %v550_v42, 0.0 }
 0x154   : > { %v551_v43 = vpop.f32.mrf.mxu1 }
 0x155   : > { %v552_v44 = vadd.f32 %v1313_v21, %v551_v43 }
 0x157   : > { %v581_v46 = vmax.f32 %v552_v44, 0.0 }
 0x159   : > { %v593_v47 = vpack.c.bf16 %v581_v46, %v580_v45 }
 0x15b   : > { %689 = vmatmul.bf16.gmra.mxu2 %v593_v47 }
 0x15c   : > { %v554_v48 = vpop.f32.mrf.mxu1 }
 0x15d   : > { %v555_v49 = vadd.f32 %v1313_v21, %v554_v48 }
 0x15f   : > { %v582_v52 = vmax.f32 %v555_v49, 0.0 }
 0x164   : > { %v556_v50 = vpop.f32.mrf.mxu1 }
 0x165   : > { %v557_v51 = vadd.f32 %v1313_v21, %v556_v50 }
 0x167   : > { %v583_v53 = vmax.f32 %v557_v51, 0.0 }
 0x169   : > { %v594_v54 = vpack.c.bf16 %v583_v53, %v582_v52 }
 0x16b   : > { %694 = vmatmul.bf16.gmra.mxu2 %v594_v54 }
 0x16c   : > { %v559_v55 = vpop.f32.mrf.mxu1 }
 0x16d   : > { %v560_v56 = vadd.f32 %v1313_v21, %v559_v55 }
 0x16f   : > { %v584_v59 = vmax.f32 %v560_v56, 0.0 }
 0x174   : > { %v561_v57 = vpop.f32.mrf.mxu1 }
 0x175   : > { %v562_v58 = vadd.f32 %v1313_v21, %v561_v57 }
 0x177   : > { %v585_v60 = vmax.f32 %v562_v58, 0.0 }
 0x179   : > { %v595_v61 = vpack.c.bf16 %v585_v60, %v584_v59 }
 0x17b   : > { %699 = vmatmul.bf16.gmra.mxu2 %v595_v61 }
 0x182   : > { %v564_v62 = vpop.f32.mrf.mxu3 }
 0x183   : > { %v565_v63 = vadd.f32 %v1313_v21, %v564_v62 }
 0x185   : > { %v586_v2 = vmax.f32 %v565_v63, 0.0 }
 0x18a   : > { %v566_v0 = vpop.f32.mrf.mxu3 }
 0x18b   : > { %v567_v1 = vadd.f32 %v1313_v21, %v566_v0 }
 0x18d   : > { %v587_v3 = vmax.f32 %v567_v1, 0.0 }
 0x18f   : > { %v596_v4 = vpack.c.bf16 %v587_v3, %v586_v2 }
 0x191   : > { %704 = vmatmul.bf16.vlgmr.msrb.gmra.mxu3 %v596_v4 }
 0x192   : > { %v569_v5 = vpop.f32.mrf.mxu3 }
 0x193   : > { %v570_v6 = vadd.f32 %v1313_v21, %v569_v5 }
 0x195   : > { %v588_v9 = vmax.f32 %v570_v6, 0.0 }
 0x19a   : > { %v571_v7 = vpop.f32.mrf.mxu3 }
 0x19b   : > { %v572_v8 = vadd.f32 %v1313_v21, %v571_v7 }
 0x19d   : > { %v589_v10 = vmax.f32 %v572_v8, 0.0 }
 0x19f   : > { %v597_v11 = vpack.c.bf16 %v589_v10, %v588_v9 }
 0x1a1   : > { %709 = vmatmul.bf16.gmra.mxu3 %v597_v11 }
 0x1ae   : > { %v675_v13 = vpop.f32.mrf.mxu2 }
 0x1af   : > { %v676_v14 = vadd.f32 %v1314_v12, %v675_v13 }
 0x1b1   : > { %715 = vmax.xlane.f32.xlu0 %v676_v14 }
 0x1b6   : > { %v677_v15 = vpop.f32.mrf.mxu2 }
 0x1b7   : > { %v678_v16 = vadd.f32 %v1314_v12, %v677_v15 }
 0x1b9   : > { %717 = vmax.xlane.f32.xlu0 %v678_v16 }
 0x1be   : > { %v680_v17 = vpop.f32.mrf.mxu2 }
 0x1bf   : > { %v681_v18 = vadd.f32 %v1314_v12, %v680_v17 }
 0x1c1   : > { %719 = vmax.xlane.f32.xlu1 %v681_v18 }
 0x1c6   : > { %v682_v20 = vpop.f32.mrf.mxu2 }
 0x1c7   : > { %v683_v22 = vadd.f32 %v1314_v12, %v682_v20 }
 0x1c9   : > { %721 = vmax.xlane.f32.xlu1 %v683_v22 }
 0x1ce   : > { %v685_v21 = vpop.f32.mrf.mxu2 }
 0x1cf   : > { %v686_v23 = vadd.f32 %v1314_v12, %v685_v21 }
 0x1d1   : > { %723 = vmax.xlane.f32.xlu2 %v686_v23 }
 0x1d6   : > { %v687_v24 = vpop.f32.mrf.mxu2 }
 0x1d7   : > { %v1540_v25 = vadd.f32 %v1314_v12, %v687_v24 }
 0x1d9   : > { %725 = vmax.xlane.f32.xlu2 %v1540_v25 }
 0x1de   : > { %v690_v26 = vpop.f32.mrf.mxu2 }
 0x1df   : > { %v1543_v27 = vadd.f32 %v1314_v12, %v690_v26 }
 0x1e1   : > { %727 = vmax.xlane.f32.xlu0 %v1543_v27 }
 0x1e6   : > { %v692_v28 = vpop.f32.mrf.mxu2 }
 0x1e7   : > { %v1546_v29 = vadd.f32 %v1314_v12, %v692_v28 }
 0x1e9   : > { %729 = vmax.xlane.f32.xlu1 %v1546_v29 }
 0x1ee   : > { %v695_v30 = vpop.f32.mrf.mxu2 }
 0x1ef   : > { %v1549_v19 = vadd.f32 %v1314_v12, %v695_v30 }
 0x1f1   : > { %731 = vmax.xlane.f32.xlu2 %v1549_v19 }
 0x1f6   : > { %v697_v31 = vpop.f32.mrf.mxu2 }
 0x1f7   : > { %v1552_v32 = vadd.f32 %v1314_v12, %v697_v31 }
 0x1f9   : > { %733 = vmax.xlane.f32.xlu0 %v1552_v32 }
 0x1fe   : > { %v700_v33 = vpop.f32.mrf.mxu2 }
 0x1ff   : > { %v1555_v34 = vadd.f32 %v1314_v12, %v700_v33 }
 0x201   : > { %735 = vmax.xlane.f32.xlu1 %v1555_v34 }
 0x206   : > { %v702_v35 = vpop.f32.mrf.mxu2 }
 0x207   : > { %v1558_v36 = vadd.f32 %v1314_v12, %v702_v35 }
 0x209   : > { %737 = vmax.xlane.f32.xlu2 %v1558_v36 }
 0x214   : > { %v705_v37 = vpop.f32.mrf.mxu3 }
 0x215   : > { %v1561_v38 = vadd.f32 %v1314_v12, %v705_v37 }
 0x217   : > { %739 = vmax.xlane.f32.xlu0 %v1561_v38 }
 0x21c   : > { %v707_v39 = vpop.f32.mrf.mxu3 }
 0x21d   : > { %v1564_v40 = vadd.f32 %v1314_v12, %v707_v39 }
 0x21f   : > { %741 = vmax.xlane.f32.xlu1 %v1564_v40 }
 0x224   : > { %v710_v41 = vpop.f32.mrf.mxu3  ;;  %v716_v42 = vpop.xlane.xlu0 %715 }
 0x225   : > { %v1567_v43 = vadd.f32 %v1314_v12, %v710_v41  ;;  %v747_v44 = vsub.f32 %v676_v14, %v716_v42 }
 0x227   : > { %v763_v45 = vmul.f32 1.442695, %v747_v44  ;;  %743 = vmax.xlane.f32.xlu2 %v1567_v43 }
 0x229   : > { %1315 = vpow2.f32 %v763_v45 }
 0x22c   : > { %v712_v46 = vpop.f32.mrf.mxu3  ;;  %v718_v47 = vpop.xlane.xlu0 %717 }
 0x22d   : > { %v1570_v48 = vadd.f32 %v1314_v12, %v712_v46  ;;  %v748_v49 = vsub.f32 %v678_v16, %v718_v47 }
 0x22f   : > { %v1572_v50 = vpop.eup %1315  ;;  %v765_v51 = vmul.f32 1.442695, %v748_v49  ;;  %745 = vmax.xlane.f32.xlu0 %v1570_v48 }
 0x230   : > { %795 = vadd.xlane.f32.xlu1 %v1572_v50 }
 0x231   : > { %1317 = vpow2.f32 %v765_v51 }
 0x234   : > { %v720_v52 = vpop.xlane.xlu1 %719 }
 0x235   : > { %v749_v53 = vsub.f32 %v681_v18, %v720_v52 }
 0x237   : > { %v1576_v54 = vpop.eup %1317  ;;  %v767_v55 = vmul.f32 1.442695, %v749_v53 }
 0x238   : > { %797 = vadd.xlane.f32.xlu2 %v1576_v54 }
 0x239   : > { %1319 = vpow2.f32 %v767_v55 }
 0x23c   : > { %v722_v56 = vpop.xlane.xlu1 %721 }
 0x23d   : > { %v750_v57 = vsub.f32 %v683_v22, %v722_v56 }
 0x23f   : > { %v1579_v58 = vpop.eup %1319  ;;  %v769_v59 = vmul.f32 1.442695, %v750_v57 }
 0x240   : > { %799 = vadd.xlane.f32.xlu0 %v1579_v58 }
 0x241   : > { %1321 = vpow2.f32 %v769_v59 }
 0x244   : > { %v724_v60 = vpop.xlane.xlu2 %723 }
 0x245   : > { %v751_v61 = vsub.f32 %v686_v23, %v724_v60 }
 0x247   : > { %v1582_v62 = vpop.eup %1321  ;;  %v771_v63 = vmul.f32 1.442695, %v751_v61 }
 0x248   : > { %801 = vadd.xlane.f32.xlu1 %v1582_v62 }
 0x249   : > { %1323 = vpow2.f32 %v771_v63 }
 0x24c   : > { %v726_v0 = vpop.xlane.xlu2 %725 }
 0x24d   : > { %v752_v1 = vsub.f32 %v1540_v25, %v726_v0 }
 0x24f   : > { %v1586_v2 = vpop.eup %1323  ;;  %v773_v3 = vmul.f32 1.442695, %v752_v1 }
 0x250   : > { %803 = vadd.xlane.f32.xlu2 %v1586_v2 }
 0x251   : > { %1325 = vpow2.f32 %v773_v3 }
 0x254   : > { %v728_v4 = vpop.xlane.xlu0 %727 }
 0x255   : > { %v753_v5 = vsub.f32 %v1543_v27, %v728_v4 }
 0x257   : > { %v1590_v6 = vpop.eup %1325  ;;  %v775_v7 = vmul.f32 1.442695, %v753_v5 }
 0x258   : > { %805 = vadd.xlane.f32.xlu0 %v1590_v6 }
 0x259   : > { %1327 = vpow2.f32 %v775_v7 }
 0x25c   : > { %v730_v8 = vpop.xlane.xlu1 %729 }
 0x25d   : > { %v754_v9 = vsub.f32 %v1546_v29, %v730_v8 }
 0x25f   : > { %v1594_v10 = vpop.eup %1327  ;;  %v777_v11 = vmul.f32 1.442695, %v754_v9 }
 0x260   : > { %807 = vadd.xlane.f32.xlu1 %v1594_v10 }
 0x261   : > { %1329 = vpow2.f32 %v777_v11 }
 0x264   : > { %v732_v12 = vpop.xlane.xlu2 %731 }
 0x265   : > { %v755_v13 = vsub.f32 %v1549_v19, %v732_v12 }
 0x267   : > { %v1598_v14 = vpop.eup %1329  ;;  %v779_v15 = vmul.f32 1.442695, %v755_v13 }
 0x268   : > { %809 = vadd.xlane.f32.xlu2 %v1598_v14 }
 0x269   : > { %1331 = vpow2.f32 %v779_v15 }
 0x26c   : > { %v734_v16 = vpop.xlane.xlu0 %733 }
 0x26d   : > { %v756_v17 = vsub.f32 %v1552_v32, %v734_v16 }
 0x26f   : > { %v1602_v18 = vpop.eup %1331  ;;  %v781_v20 = vmul.f32 1.442695, %v756_v17 }
 0x270   : > { %811 = vadd.xlane.f32.xlu0 %v1602_v18 }
 0x271   : > { %1333 = vpow2.f32 %v781_v20 }
 0x274   : > { %v736_v22 = vpop.xlane.xlu1 %735 }
 0x275   : > { %v757_v21 = vsub.f32 %v1555_v34, %v736_v22 }
 0x277   : > { %v1606_v23 = vpop.eup %1333  ;;  %v783_v24 = vmul.f32 1.442695, %v757_v21 }
 0x278   : > { %813 = vadd.xlane.f32.xlu1 %v1606_v23 }
 0x279   : > { %1335 = vpow2.f32 %v783_v24 }
 0x27c   : > { %v738_v25 = vpop.xlane.xlu2 %737 }
 0x27d   : > { %v758_v26 = vsub.f32 %v1558_v36, %v738_v25 }
 0x27f   : > { %v1610_v27 = vpop.eup %1335  ;;  %v785_v28 = vmul.f32 1.442695, %v758_v26 }
 0x280   : > { %815 = vadd.xlane.f32.xlu2 %v1610_v27 }
 0x281   : > { %1337 = vpow2.f32 %v785_v28 }
 0x287   : > { %v1613_v29 = vpop.eup %1337 }
 0x288   : > { %817 = vadd.xlane.f32.xlu0 %v1613_v29 }
 0x28a   : > { %v740_v30 = vpop.xlane.xlu0 %739 }
 0x28b   : > { %v759_v19 = vsub.f32 %v1561_v38, %v740_v30 }
 0x28d   : > { %v787_v31 = vmul.f32 1.442695, %v759_v19 }
 0x28f   : > { %1339 = vpow2.f32 %v787_v31 }
 0x292   : > { %v742_v32 = vpop.xlane.xlu1 %741 }
 0x293   : > { %v760_v33 = vsub.f32 %v1564_v40, %v742_v32 }
 0x295   : > { %v1618_v34 = vpop.eup %1339  ;;  %v789_v35 = vmul.f32 1.442695, %v760_v33 }
 0x296   : > { %819 = vadd.xlane.f32.xlu1 %v1618_v34 }
 0x297   : > { %1341 = vpow2.f32 %v789_v35 }
 0x29a   : > { %v744_v36 = vpop.xlane.xlu2 %743 }
 0x29b   : > { %v761_v37 = vsub.f32 %v1567_v43, %v744_v36 }
 0x29d   : > { %v1622_v39 = vpop.eup %1341  ;;  %v791_v41 = vmul.f32 1.442695, %v761_v37 }
 0x29e   : > { %821 = vadd.xlane.f32.xlu2 %v1622_v39 }
 0x29f   : > { %1343 = vpow2.f32 %v791_v41 }
 0x2a2   : > { %v746_v38 = vpop.xlane.xlu0 %745 }
 0x2a3   : > { %v762_v42 = vsub.f32 %v1570_v48, %v746_v38  ;;  %v796_v44 = vpop.xlane.xlu1 %795 }
 0x2a4   : > { %1345 = vrcp.f32 %v796_v44  ;;  %v838_v52 = vand.u32 2147483648, %v796_v44  ;;  %v836_v53 = vand.u32 2147483647, %v796_v44  ;;  %vm832_vm2 = vweird.f32 %v796_v44 }
 0x2a5   : > { %v1626_v40 = vpop.eup %1343  ;;  %v793_v45 = vmul.f32 1.442695, %v762_v42 }
 0x2a6   : > { %823 = vadd.xlane.f32.xlu0 %v1626_v40  ;;  %v839_v57 = vor.u32 1.1754944e-38, %v838_v52  ;;  %vm837_vm4 = vcmp.eq.f32.partialorder %v836_v53, 8.507059e+37 }
 0x2a7   : > { %1347 = vpow2.f32 %v793_v45 }
 0x2aa   : > { %v1346_v46 = vpop.eup %1345 }
 0x2ab   : > { %v828_v43 = vmul.f32 %v1346_v46, %v796_v44  ;;  %v798_v47 = vpop.xlane.xlu2 %797  ;;  %vm833_vm1 = vweird.f32 %v1346_v46 }
 0x2ac   : > { %1349 = vrcp.f32 %v798_v47  ;;  %vm834_vm3 = vmor %vm832_vm2, %vm833_vm1  ;;  %v853_v3 = vand.u32 2147483648, %v798_v47  ;;  %v851_v5 = vand.u32 2147483647, %v798_v47  ;;  %vm847_vm6 = vweird.f32 %v798_v47 }
 0x2ad   : > { %v1629_v49 = vpop.eup %1347  ;;  %v829_v51 = vsub.f32 1.0, %v828_v43 }
 0x2ae   : > { %825 = vadd.xlane.f32.xlu1 %v1629_v49  ;;  %v854_v9 = vor.u32 1.1754944e-38, %v853_v3  ;;  %vm852_vm8 = vcmp.eq.f32.partialorder %v851_v5, 8.507059e+37 }
 0x2af   : > { %v830_v48 = vmul.f32 %v1346_v46, %v829_v51 }
 0x2b1   : > { %v831_v55 = vadd.f32 %v1346_v46, %v830_v48 }
 0x2b2   : > { %v1350_v56 = vpop.eup %1349 }
 0x2b3   : > { %v835_v59 = vsel %vm834_vm3, %v1346_v46, %v831_v55  ;;  %v843_v60 = vmul.f32 %v1350_v56, %v798_v47  ;;  %v800_v61 = vpop.xlane.xlu0 %799  ;;  %vm848_vm5 = vweird.f32 %v1350_v56 }
 0x2b4   : > { %v840_v63 = vsel %vm837_vm4, %v839_v57, %v835_v59  ;;  %1351 = vrcp.f32 %v800_v61  ;;  %vm849_vm7 = vmor %vm847_vm6, %vm848_vm5  ;;  %v868_v17 = vand.u32 2147483648, %v800_v61  ;;  %v866_v22 = vand.u32 2147483647, %v800_v61 }
 0x2b5   : > { %v841_v0 = vmul.f32 %v1572_v50, %v840_v63  ;;  %v844_v1 = vsub.f32 1.0, %v843_v60  ;;  %vm862_vm10 = vweird.f32 %v800_v61 }
 0x2b6   : > { %v869_v25 = vor.u32 1.1754944e-38, %v868_v17  ;;  %vm867_vm12 = vcmp.eq.f32.partialorder %v866_v22, 8.507059e+37 }
 0x2b7   : > { %1067 = vst [vmem:[%s1636_s11] sm:$0xff] %v841_v0  ;;  %v845_v4 = vmul.f32 %v1350_v56, %v844_v1 }
 0x2b9   : > { %v846_v7 = vadd.f32 %v1350_v56, %v845_v4 }
 0x2ba   : > { %v1352_v8 = vpop.eup %1351 }
 0x2bb   : > { %v850_v11 = vsel %vm849_vm7, %v1350_v56, %v846_v7  ;;  %v858_v12 = vmul.f32 %v1352_v8, %v800_v61  ;;  %v802_v13 = vpop.xlane.xlu1 %801  ;;  %vm863_vm9 = vweird.f32 %v1352_v8 }
 0x2bc   : > { %v855_v15 = vsel %vm852_vm8, %v854_v9, %v850_v11  ;;  %1353 = vrcp.f32 %v802_v13  ;;  %vm864_vm11 = vmor %vm862_vm10, %vm863_vm9  ;;  %v883_v32 = vand.u32 2147483648, %v802_v13  ;;  %v881_v35 = vand.u32 2147483647, %v802_v13 }
 0x2bd   : > { %v856_v50 = vmul.f32 %v1576_v54, %v855_v15  ;;  %v859_v16 = vsub.f32 1.0, %v858_v12  ;;  %vm877_vm14 = vweird.f32 %v802_v13 }
 0x2be   : > { %v884_v41 = vor.u32 1.1754944e-38, %v883_v32  ;;  %vm882_vm0 = vcmp.eq.f32.partialorder %v881_v35, 8.507059e+37 }
 0x2bf   : > { %1068 = vst [vmem:[%s1636_s11 + $0x8] sm:$0xff] %v856_v50  ;;  %v860_v20 = vmul.f32 %v1352_v8, %v859_v16 }
 0x2c1   : > { %v861_v21 = vadd.f32 %v1352_v8, %v860_v20 }
 0x2c2   : > { %v1354_v24 = vpop.eup %1353 }
 0x2c3   : > { %v865_v26 = vsel %vm864_vm11, %v1352_v8, %v861_v21  ;;  %v873_v28 = vmul.f32 %v1354_v24, %v802_v13  ;;  %v804_v30 = vpop.xlane.xlu2 %803  ;;  %vm878_vm13 = vweird.f32 %v1354_v24 }
 0x2c4   : > { %v870_v19 = vsel %vm867_vm12, %v869_v25, %v865_v26  ;;  %1355 = vrcp.f32 %v804_v30  ;;  %vm879_vm15 = vmor %vm877_vm14, %vm878_vm13  ;;  %v898_v43 = vand.u32 2147483648, %v804_v30  ;;  %v896_v51 = vand.u32 2147483647, %v804_v30 }
 0x2c5   : > { %v871_v54 = vmul.f32 %v1579_v58, %v870_v19  ;;  %v874_v31 = vsub.f32 1.0, %v873_v28  ;;  %vm892_vm2 = vweird.f32 %v804_v30 }
 0x2c6   : > { %v899_v53 = vor.u32 1.1754944e-38, %v898_v43  ;;  %vm897_vm4 = vcmp.eq.f32.partialorder %v896_v51, 8.507059e+37 }
 0x2c7   : > { %1069 = vst [vmem:[%s1636_s11 + $0x10] sm:$0xff] %v871_v54  ;;  %v875_v33 = vmul.f32 %v1354_v24, %v874_v31 }
 0x2c9   : > { %v876_v36 = vadd.f32 %v1354_v24, %v875_v33 }
 0x2ca   : > { %v1356_v37 = vpop.eup %1355 }
 0x2cb   : > { %v880_v38 = vsel %vm879_vm15, %v1354_v24, %v876_v36  ;;  %v888_v42 = vmul.f32 %v1356_v37, %v804_v30  ;;  %v806_v44 = vpop.xlane.xlu0 %805  ;;  %vm893_vm1 = vweird.f32 %v1356_v37 }
 0x2cc   : > { %v885_v45 = vsel %vm882_vm0, %v884_v41, %v880_v38  ;;  %1357 = vrcp.f32 %v806_v44  ;;  %vm894_vm3 = vmor %vm892_vm2, %vm893_vm1  ;;  %v913_v61 = vand.u32 2147483648, %v806_v44  ;;  %v911_v0 = vand.u32 2147483647, %v806_v44 }
 0x2cd   : > { %v886_v58 = vmul.f32 %v1582_v62, %v885_v45  ;;  %v889_v46 = vsub.f32 1.0, %v888_v42  ;;  %vm907_vm6 = vweird.f32 %v806_v44 }
 0x2ce   : > { %v914_v4 = vor.u32 1.1754944e-38, %v913_v61  ;;  %vm912_vm8 = vcmp.eq.f32.partialorder %v911_v0, 8.507059e+37 }
 0x2cf   : > { %1070 = vst [vmem:[%s1636_s11 + $0x18] sm:$0xff] %v886_v58  ;;  %v890_v47 = vmul.f32 %v1356_v37, %v889_v46 }
 0x2d1   : > { %v891_v52 = vadd.f32 %v1356_v37, %v890_v47 }
 0x2d2   : > { %v1358_v48 = vpop.eup %1357 }
 0x2d3   : > { %v895_v55 = vsel %vm894_vm3, %v1356_v37, %v891_v52  ;;  %v903_v56 = vmul.f32 %v1358_v48, %v806_v44  ;;  %v808_v57 = vpop.xlane.xlu1 %807  ;;  %vm908_vm5 = vweird.f32 %v1358_v48 }
 0x2d4   : > { %v900_v59 = vsel %vm897_vm4, %v899_v53, %v895_v55  ;;  %1359 = vrcp.f32 %v808_v57  ;;  %vm909_vm7 = vmor %vm907_vm6, %vm908_vm5  ;;  %v928_v12 = vand.u32 2147483648, %v808_v57  ;;  %v926_v15 = vand.u32 2147483647, %v808_v57 }
 0x2d5   : > { %v901_v62 = vmul.f32 %v1586_v2, %v900_v59  ;;  %v904_v60 = vsub.f32 1.0, %v903_v56  ;;  %vm922_vm10 = vweird.f32 %v808_v57 }
 0x2d6   : > { %v929_v17 = vor.u32 1.1754944e-38, %v928_v12  ;;  %vm927_vm12 = vcmp.eq.f32.partialorder %v926_v15, 8.507059e+37 }
 0x2d7   : > { %1071 = vst [vmem:[%s1636_s11 + $0x20] sm:$0xff] %v901_v62  ;;  %v905_v63 = vmul.f32 %v1358_v48, %v904_v60 }
 0x2d9   : > { %v906_v1 = vadd.f32 %v1358_v48, %v905_v63 }
 0x2da   : > { %v1360_v3 = vpop.eup %1359 }
 0x2db   : > { %v910_v5 = vsel %vm909_vm7, %v1358_v48, %v906_v1  ;;  %v918_v7 = vmul.f32 %v1360_v3, %v808_v57  ;;  %v810_v8 = vpop.xlane.xlu2 %809  ;;  %vm923_vm9 = vweird.f32 %v1360_v3 }
 0x2dc   : > { %v915_v9 = vsel %vm912_vm8, %v914_v4, %v910_v5  ;;  %1361 = vrcp.f32 %v810_v8  ;;  %vm924_vm11 = vmor %vm922_vm10, %vm923_vm9  ;;  %v943_v26 = vand.u32 2147483648, %v810_v8  ;;  %v941_v30 = vand.u32 2147483647, %v810_v8 }
 0x2dd   : > { %v916_v2 = vmul.f32 %v1590_v6, %v915_v9  ;;  %v919_v11 = vsub.f32 1.0, %v918_v7  ;;  %vm937_vm14 = vweird.f32 %v810_v8 }
 0x2de   : > { %v944_v31 = vor.u32 1.1754944e-38, %v943_v26  ;;  %vm942_vm0 = vcmp.eq.f32.partialorder %v941_v30, 8.507059e+37 }
 0x2df   : > { %1072 = vst [vmem:[%s1636_s11 + $0x28] sm:$0xff] %v916_v2  ;;  %v920_v13 = vmul.f32 %v1360_v3, %v919_v11 }
 0x2e1   : > { %v921_v50 = vadd.f32 %v1360_v3, %v920_v13 }
 0x2e2   : > { %v1362_v16 = vpop.eup %1361 }
 0x2e3   : > { %v925_v20 = vsel %vm924_vm11, %v1360_v3, %v921_v50  ;;  %v933_v22 = vmul.f32 %v1362_v16, %v810_v8  ;;  %v812_v21 = vpop.xlane.xlu0 %811  ;;  %vm938_vm13 = vweird.f32 %v1362_v16 }
 0x2e4   : > { %v930_v24 = vsel %vm927_vm12, %v929_v17, %v925_v20  ;;  %1363 = vrcp.f32 %v812_v21  ;;  %vm939_vm15 = vmor %vm937_vm14, %vm938_vm13  ;;  %v958_v41 = vand.u32 2147483648, %v812_v21  ;;  %v956_v42 = vand.u32 2147483647, %v812_v21 }
 0x2e5   : > { %v931_v6 = vmul.f32 %v1594_v10, %v930_v24  ;;  %v934_v25 = vsub.f32 1.0, %v933_v22  ;;  %vm952_vm2 = vweird.f32 %v812_v21 }
 0x2e6   : > { %v959_v58 = vor.u32 1.1754944e-38, %v958_v41  ;;  %vm957_vm4 = vcmp.eq.f32.partialorder %v956_v42, 8.507059e+37 }
 0x2e7   : > { %1073 = vst [vmem:[%s1636_s11 + $0x30] sm:$0xff] %v931_v6  ;;  %v935_v28 = vmul.f32 %v1362_v16, %v934_v25 }
 0x2e9   : > { %v936_v19 = vadd.f32 %v1362_v16, %v935_v28 }
 0x2ea   : > { %v1364_v54 = vpop.eup %1363 }
 0x2eb   : > { %v940_v32 = vsel %vm939_vm15, %v1362_v16, %v936_v19  ;;  %v948_v33 = vmul.f32 %v1364_v54, %v812_v21  ;;  %v814_v35 = vpop.xlane.xlu1 %813  ;;  %vm953_vm1 = vweird.f32 %v1364_v54 }
 0x2ec   : > { %v945_v36 = vsel %vm942_vm0, %v944_v31, %v940_v32  ;;  %1365 = vrcp.f32 %v814_v35  ;;  %vm954_vm3 = vmor %vm952_vm2, %vm953_vm1  ;;  %v973_v48 = vand.u32 2147483648, %v814_v35  ;;  %v971_v55 = vand.u32 2147483647, %v814_v35 }
 0x2ed   : > { %v946_v10 = vmul.f32 %v1598_v14, %v945_v36  ;;  %v949_v37 = vsub.f32 1.0, %v948_v33  ;;  %vm967_vm6 = vweird.f32 %v814_v35 }
 0x2ee   : > { %v974_v59 = vor.u32 1.1754944e-38, %v973_v48  ;;  %vm972_vm8 = vcmp.eq.f32.partialorder %v971_v55, 8.507059e+37 }
 0x2ef   : > { %1074 = vst [vmem:[%s1636_s11 + $0x38] sm:$0xff] %v946_v10  ;;  %v950_v38 = vmul.f32 %v1364_v54, %v949_v37 }
 0x2f1   : > { %v951_v44 = vadd.f32 %v1364_v54, %v950_v38 }
 0x2f2   : > { %v1366_v45 = vpop.eup %1365 }
 0x2f3   : > { %v955_v46 = vsel %vm954_vm3, %v1364_v54, %v951_v44  ;;  %v963_v43 = vmul.f32 %v1366_v45, %v814_v35  ;;  %v816_v47 = vpop.xlane.xlu2 %815  ;;  %vm968_vm5 = vweird.f32 %v1366_v45 }
 0x2f4   : > { %v960_v51 = vsel %vm957_vm4, %v959_v58, %v955_v46  ;;  %1367 = vrcp.f32 %v816_v47  ;;  %vm969_vm7 = vmor %vm967_vm6, %vm968_vm5  ;;  %v988_v1 = vand.u32 2147483648, %v816_v47  ;;  %v986_v4 = vand.u32 2147483647, %v816_v47 }
 0x2f5   : > { %v961_v14 = vmul.f32 %v1602_v18, %v960_v51  ;;  %v964_v52 = vsub.f32 1.0, %v963_v43  ;;  %vm982_vm10 = vweird.f32 %v816_v47 }
 0x2f6   : > { %v989_v8 = vor.u32 1.1754944e-38, %v988_v1  ;;  %vm987_vm12 = vcmp.eq.f32.partialorder %v986_v4, 8.507059e+37 }
 0x2f7   : > { %1075 = vst [vmem:[%s1636_s11 + $0x40] sm:$0xff] %v961_v14  ;;  %v965_v53 = vmul.f32 %v1366_v45, %v964_v52 }
 0x2f9   : > { %v966_v56 = vadd.f32 %v1366_v45, %v965_v53 }
 0x2fa   : > { %v1368_v57 = vpop.eup %1367 }
 0x2fb   : > { %v970_v62 = vsel %vm969_vm7, %v1366_v45, %v966_v56  ;;  %v978_v60 = vmul.f32 %v1368_v57, %v816_v47  ;;  %v818_v61 = vpop.xlane.xlu0 %817  ;;  %vm983_vm9 = vweird.f32 %v1368_v57 }
 0x2fc   : > { %v975_v63 = vsel %vm972_vm8, %v974_v59, %v970_v62  ;;  %1369 = vrcp.f32 %v818_v61  ;;  %vm984_vm11 = vmor %vm982_vm10, %vm983_vm9  ;;  %v1001_v50 = vand.u32 2147483647, %v818_v61  ;;  %vm997_vm14 = vweird.f32 %v818_v61 }
 0x2fd   : > { %v976_v18 = vmul.f32 %v1606_v23, %v975_v63  ;;  %v979_v0 = vsub.f32 1.0, %v978_v60  ;;  %v1003_v23 = vand.u32 2147483648, %v818_v61 }
 0x2fe   : > { %vm1002_vm0 = vcmp.eq.f32.partialorder %v1001_v50, 8.507059e+37 }
 0x2ff   : > { %1076 = vst [vmem:[%s1636_s11 + $0x48] sm:$0xff] %v976_v18  ;;  %v980_v3 = vmul.f32 %v1368_v57, %v979_v0  ;;  %v1004_v20 = vor.u32 1.1754944e-38, %v1003_v23 }
 0x301   : > { %v981_v5 = vadd.f32 %v1368_v57, %v980_v3 }
 0x302   : > { %v1370_v7 = vpop.eup %1369 }
 0x303   : > { %v985_v9 = vsel %vm984_vm11, %v1368_v57, %v981_v5  ;;  %v993_v2 = vmul.f32 %v1370_v7, %v818_v61  ;;  %vm998_vm13 = vweird.f32 %v1370_v7 }
 0x304   : > { %v990_v11 = vsel %vm987_vm12, %v989_v8, %v985_v9  ;;  %vm999_vm15 = vmor %vm997_vm14, %vm998_vm13 }
 0x305   : > { %v991_v12 = vmul.f32 %v1610_v27, %v990_v11  ;;  %v994_v13 = vsub.f32 1.0, %v993_v2 }
 0x307   : > { %1077 = vst [vmem:[%s1636_s11 + $0x50] sm:$0xff] %v991_v12  ;;  %v995_v15 = vmul.f32 %v1370_v7, %v994_v13 }
 0x309   : > { %v996_v16 = vadd.f32 %v1370_v7, %v995_v15  ;;  %v820_v17 = vpop.xlane.xlu1 %819 }
 0x30a   : > { %1371 = vrcp.f32 %v820_v17  ;;  %v1018_v28 = vand.u32 2147483648, %v820_v17  ;;  %v1016_v19 = vand.u32 2147483647, %v820_v17  ;;  %vm1012_vm2 = vweird.f32 %v820_v17 }
 0x30b   : > { %v1000_v22 = vsel %vm999_vm15, %v1370_v7, %v996_v16 }
 0x30c   : > { %v1005_v21 = vsel %vm1002_vm0, %v1004_v20, %v1000_v22  ;;  %v1019_v32 = vor.u32 1.1754944e-38, %v1018_v28  ;;  %vm1017_vm4 = vcmp.eq.f32.partialorder %v1016_v19, 8.507059e+37 }
 0x30d   : > { %v1006_v24 = vmul.f32 %v1613_v29, %v1005_v21 }
 0x30f   : > { %1078 = vst [vmem:[%s1636_s11 + $0x58] sm:$0xff] %v1006_v24 }
 0x310   : > { %v1372_v27 = vpop.eup %1371 }
 0x311   : > { %v1008_v6 = vmul.f32 %v1372_v27, %v820_v17  ;;  %v822_v25 = vpop.xlane.xlu2 %821  ;;  %vm1013_vm1 = vweird.f32 %v1372_v27 }
 0x312   : > { %1373 = vrcp.f32 %v822_v25  ;;  %vm1014_vm3 = vmor %vm1012_vm2, %vm1013_vm1  ;;  %v1033_v41 = vand.u32 2147483648, %v822_v25  ;;  %v1031_v42 = vand.u32 2147483647, %v822_v25  ;;  %vm1027_vm6 = vweird.f32 %v822_v25 }
 0x313   : > { %v1009_v26 = vsub.f32 1.0, %v1008_v6 }
 0x314   : > { %v1034_v58 = vor.u32 1.1754944e-38, %v1033_v41  ;;  %vm1032_vm8 = vcmp.eq.f32.partialorder %v1031_v42, 8.507059e+37 }
 0x315   : > { %v1010_v30 = vmul.f32 %v1372_v27, %v1009_v26 }
 0x317   : > { %v1011_v54 = vadd.f32 %v1372_v27, %v1010_v30 }
 0x318   : > { %v1374_v31 = vpop.eup %1373 }
 0x319   : > { %v1015_v33 = vsel %vm1014_vm3, %v1372_v27, %v1011_v54  ;;  %v1023_v35 = vmul.f32 %v1374_v31, %v822_v25  ;;  %v824_v29 = vpop.xlane.xlu0 %823  ;;  %vm1028_vm5 = vweird.f32 %v1374_v31 }
 0x31a   : > { %v1020_v36 = vsel %vm1017_vm4, %v1019_v32, %v1015_v33  ;;  %1375 = vrcp.f32 %v824_v29  ;;  %vm1029_vm7 = vmor %vm1027_vm6, %vm1028_vm5  ;;  %v1048_v52 = vand.u32 2147483648, %v824_v29  ;;  %v1046_v53 = vand.u32 2147483647, %v824_v29 }
 0x31b   : > { %v1021_v10 = vmul.f32 %v1618_v34, %v1020_v36  ;;  %v1024_v37 = vsub.f32 1.0, %v1023_v35  ;;  %vm1042_vm10 = vweird.f32 %v824_v29 }
 0x31c   : > { %v1049_v57 = vor.u32 1.1754944e-38, %v1048_v52  ;;  %vm1047_vm12 = vcmp.eq.f32.partialorder %v1046_v53, 8.507059e+37 }
 0x31d   : > { %1079 = vst [vmem:[%s1636_s11 + $0x60] sm:$0xff] %v1021_v10  ;;  %v1025_v38 = vmul.f32 %v1374_v31, %v1024_v37 }
 0x31f   : > { %v1026_v44 = vadd.f32 %v1374_v31, %v1025_v38 }
 0x320   : > { %v1376_v45 = vpop.eup %1375 }
 0x321   : > { %v1030_v46 = vsel %vm1029_vm7, %v1374_v31, %v1026_v44  ;;  %v1038_v43 = vmul.f32 %v1376_v45, %v824_v29  ;;  %v826_v47 = vpop.xlane.xlu1 %825  ;;  %vm1043_vm9 = vweird.f32 %v1376_v45 }
 0x322   : > { %v1035_v51 = vsel %vm1032_vm8, %v1034_v58, %v1030_v46  ;;  %1377 = vrcp.f32 %v826_v47  ;;  %vm1044_vm11 = vmor %vm1042_vm10, %vm1043_vm9  ;;  %v1063_v63 = vand.u32 2147483648, %v826_v47  ;;  %v1061_v0 = vand.u32 2147483647, %v826_v47 }
 0x323   : > { %v1036_v34 = vmul.f32 %v1622_v39, %v1035_v51  ;;  %v1039_v14 = vsub.f32 1.0, %v1038_v43  ;;  %vm1057_vm14 = vweird.f32 %v826_v47 }
 0x324   : > { %v1064_v3 = vor.u32 1.1754944e-38, %v1063_v63  ;;  %vm1062_vm0 = vcmp.eq.f32.partialorder %v1061_v0, 8.507059e+37 }
 0x325   : > { %1080 = vst [vmem:[%s1636_s11 + $0x68] sm:$0xff] %v1036_v34  ;;  %v1040_v48 = vmul.f32 %v1376_v45, %v1039_v14 }
 0x327   : > { %v1041_v55 = vadd.f32 %v1376_v45, %v1040_v48 }
 0x328   : > { %v1378_v56 = vpop.eup %1377 }
 0x329   : > { %v1045_v59 = vsel %vm1044_vm11, %v1376_v45, %v1041_v55  ;;  %v1053_v62 = vmul.f32 %v1378_v56, %v826_v47  ;;  %vm1058_vm13 = vweird.f32 %v1378_v56 }
 0x32a   : > { %v1050_v60 = vsel %vm1047_vm12, %v1049_v57, %v1045_v59  ;;  %vm1059_vm15 = vmor %vm1057_vm14, %vm1058_vm13 }
 0x32b   : > { %v1051_v61 = vmul.f32 %v1626_v40, %v1050_v60  ;;  %v1054_v39 = vsub.f32 1.0, %v1053_v62 }
 0x32d   : > { %1081 = vst [vmem:[%s1636_s11 + $0x70] sm:$0xff] %v1051_v61  ;;  %v1055_v18 = vmul.f32 %v1378_v56, %v1054_v39 }
 0x32f   : > { %v1056_v1 = vadd.f32 %v1378_v56, %v1055_v18 }
 0x331   : > { %v1060_v4 = vsel %vm1059_vm15, %v1378_v56, %v1056_v1 }
 0x332   : > { %v1065_v5 = vsel %vm1062_vm0, %v1064_v3, %v1060_v4 }
 0x333   : > { %v1066_v7 = vmul.f32 %v1629_v49, %v1065_v5 }
 0x335   : > { %1082 = vst [vmem:[%s1636_s11 + $0x78] sm:$0xff] %v1066_v7 }
 0x336 PF: > { %s17_s24 = sadd.s32 1, %s1385_s24  }
 0x337   : > { %p14_p4 = scmp.ge.s32.totalorder %s17_s24, 4  }
 0x339   :  { %16 = sbr.rel (!%p14_p4) target bundleno = 1 (0x1), region = 78 }

</bundles_post_ra>
